<compile_context>
chip_gen: v5e
topology: v5e:2x2
jax: 0.10.0
libtpu: 0.0.40
codegen_flags: <defaults>
</compile_context>

<pallas_src>
import functools

import jax
import jax.numpy as jnp
from jax import lax
from jax.experimental import pallas as pl
from jax.experimental.pallas import tpu as pltpu

GAMMA = 1.5
ALPHA = 0.25
LANES = 128
SUBLANES = 8

MAX_BLOCK_ROWS = 8192          # 8192 * 128 * 4 B = 4 MiB per f32 input block
CHUNK_ROWS = 512               # in-kernel compute chunk (bounds f32 temps to ~2 MiB)
FORCE_SPLIT_ROWS = 1024        # >= this many rows -> at least 2 blocks (v7x megacore)
VMEM_LIMIT_BYTES = 48 * 1024 * 1024


def _cdiv(a, b):
    return -(-a // b)


def _round_up(a, b):
    return _cdiv(a, b) * b


def _focal_elementwise(x, y, *, gamma, alpha):
    """Numerically stable BCE-with-logits + focal modulation (f32 in/out).

    EUP usage: exp, log1p, vrcp(approx), sqrt per element; reciprocal is the
    approximate EUP path refined by one Newton step (avoids the VALU divide).
    """
    e = jnp.exp(-jnp.abs(x))                        # exp(-|x|), reused twice
    # BCEWithLogitsLoss(reduction='none'): max(x,0) - x*y + log(1 + exp(-|x|))
    bce = jnp.maximum(x, 0.0) - x * y + jnp.log1p(e)
    d = 1.0 + e
    inv = pl.reciprocal(d, approx=True)             # EUP vrcp
    inv = inv * (2.0 - d * inv)                     # one NR step -> ~f32 accuracy
    p = jnp.where(x >= 0.0, inv, e * inv)           # sigmoid(x)
    # p_t = y*p + (1-y)*(1-p)  =>  z = 1 - p_t = p + y*(1 - 2p)   (folded)
    z = p + y * (1.0 - 2.0 * p)
    alpha_factor = (1.0 - alpha) + y * (2.0 * alpha - 1.0)
    if gamma == 1.5:
        modulating = z * jnp.sqrt(z)                # z**1.5 without pow
    elif gamma == 2.0:
        modulating = z * z
    elif gamma == 1.0:
        modulating = z
    else:
        modulating = jnp.power(z, gamma)
    return bce * alpha_factor * modulating


def _chunk_loss(pred_ref, true_ref, row0, nrows, *, gamma, alpha):
    x = pred_ref[pl.ds(row0, nrows), :].astype(jnp.float32)
    y = true_ref[pl.ds(row0, nrows), :].astype(jnp.float32)
    return _focal_elementwise(x, y, gamma=gamma, alpha=alpha)


def _block_partial_sum(pred_ref, true_ref, *, block_rows, gamma, alpha,
                       do_mask, block_base, total):
    """Sum of focal loss over one (block_rows, 128) block -> one (8,128) vreg."""
    n_full = block_rows // CHUNK_ROWS
    rem = block_rows % CHUNK_ROWS            # static, multiple of 8

    def chunk_sum(row0, nrows):
        loss = _chunk_loss(pred_ref, true_ref, row0, nrows, gamma=gamma, alpha=alpha)
        if do_mask:
            row = lax.broadcasted_iota(jnp.int32, loss.shape, 0)
            lane = lax.broadcasted_iota(jnp.int32, loss.shape, 1)
            idx = block_base + (row0 + row) * LANES + lane
            # select (NOT multiply-by-mask): out-of-bounds rows may be NaN/Inf
            loss = jnp.where(idx < total, loss, 0.0)
        # Sublane-group reduction with plain vector adds (no per-step XLU
        # cross-lane reduce); the final cross-lane sum happens once outside.
        return jnp.sum(loss.reshape(-1, SUBLANES, LANES), axis=0)

    acc = jnp.zeros((SUBLANES, LANES), jnp.float32)
    if n_full > 0:
        def body(c, a):
            row0 = pl.multiple_of(c * CHUNK_ROWS, CHUNK_ROWS)
            return a + chunk_sum(row0, CHUNK_ROWS)
        acc = lax.fori_loop(0, n_full, body, acc)
    if rem:
        acc = acc + chunk_sum(n_full * CHUNK_ROWS, rem)
    return acc


def _focal_partial_sum_kernel(pred_ref, true_ref, partial_ref, *,
                              total, block_rows, num_blocks, masked, gamma, alpha):
    i = pl.program_id(0)
    block_base = i * (block_rows * LANES)
    kw = dict(block_rows=block_rows, gamma=gamma, alpha=alpha,
              block_base=block_base, total=total)

    if not masked:
        partial_ref[...] = _block_partial_sum(pred_ref, true_ref, do_mask=False, **kw)
    elif num_blocks == 1:
        partial_ref[...] = _block_partial_sum(pred_ref, true_ref, do_mask=True, **kw)
    else:
        # Only the last block can contain padding / out-of-bounds rows:
        @pl.when(i != num_blocks - 1)
        def _():
            partial_ref[...] = _block_partial_sum(pred_ref, true_ref, do_mask=False, **kw)

        @pl.when(i == num_blocks - 1)
        def _():
            partial_ref[...] = _block_partial_sum(pred_ref, true_ref, do_mask=True, **kw)


def _focal_none_kernel(pred_ref, true_ref, out_ref, *, block_rows, gamma, alpha):
    n_full = block_rows // CHUNK_ROWS
    rem = block_rows % CHUNK_ROWS

    def write_chunk(row0, nrows):
        loss = _chunk_loss(pred_ref, true_ref, row0, nrows, gamma=gamma, alpha=alpha)
        out_ref[pl.ds(row0, nrows), :] = loss.astype(out_ref.dtype)

    if n_full > 0:
        def body(c, carry):
            row0 = pl.multiple_of(c * CHUNK_ROWS, CHUNK_ROWS)
            write_chunk(row0, CHUNK_ROWS)
            return carry
        lax.fori_loop(0, n_full, body, 0)
    if rem:
        write_chunk(n_full * CHUNK_ROWS, rem)


def _as_slab(a, padded_rows):
    """Lane-dense (padded_rows, 128) slab. Zero-copy reshape when a.size is a
    multiple of 8*128; otherwise a single small zero-pad (copy) is needed."""
    flat = a.reshape(-1)
    pad = padded_rows * LANES - flat.size
    if pad:
        # TODO(synk): a fully copy-free path for non-1024-aligned sizes would
        # need a separate tiny tail kernel; the <1024-element zero-pad copy is
        # accepted here.
        flat = jnp.pad(flat, (0, pad))
    return flat.reshape(padded_rows, LANES)


def focal_loss(pred, true, reduction="mean", gamma=GAMMA, alpha=ALPHA):
    """FocalLoss(BCEWithLogitsLoss(reduction=reduction), gamma, alpha) forward."""
    orig_shape = pred.shape
    total = pred.size
    rows = _cdiv(total, LANES)
    padded_rows = _round_up(rows, SUBLANES)

    # Even block split; force >=2 blocks for large tensors (v7x has 2 TCs).
    min_blocks = 2 if padded_rows >= FORCE_SPLIT_ROWS else 1
    num_blocks = max(_cdiv(padded_rows, MAX_BLOCK_ROWS), min_blocks)
    block_rows = _round_up(_cdiv(padded_rows, num_blocks), SUBLANES)
    num_blocks = _cdiv(padded_rows, block_rows)
    # Any element past `total` (explicit zero-pad or partial-block garbage)
    # must be masked in the reduction path.
    masked = num_blocks * block_rows * LANES != total

    pred2d = _as_slab(pred, padded_rows)
    true2d = _as_slab(true, padded_rows)

    in_specs = [
        pl.BlockSpec((block_rows, LANES), lambda i: (i, 0)),
        pl.BlockSpec((block_rows, LANES), lambda i: (i, 0)),
    ]
    cparams = pltpu.CompilerParams(
        dimension_semantics=("parallel",),
        vmem_limit_bytes=VMEM_LIMIT_BYTES,
    )

    if reduction in ("mean", "sum"):
        kern = functools.partial(
            _focal_partial_sum_kernel,
            total=total, block_rows=block_rows, num_blocks=num_blocks,
            masked=masked, gamma=gamma, alpha=alpha,
        )
        partials = pl.pallas_call(
            kern,
            out_shape=jax.ShapeDtypeStruct((num_blocks, SUBLANES, LANES), jnp.float32),
            grid_spec=pltpu.PrefetchScalarGridSpec(
                num_scalar_prefetch=0,
                grid=(num_blocks,),
                in_specs=in_specs,
                out_specs=pl.BlockSpec((None, SUBLANES, LANES), lambda i: (i, 0, 0)),
            ),
            compiler_params=cparams,
        )(pred2d, true2d)
        s = jnp.sum(partials)            # single tiny cross-lane reduce outside
        if reduction == "mean":
            return s / jnp.float32(total)
        return s
    else:  # 'none'
        kern = functools.partial(
            _focal_none_kernel, block_rows=block_rows, gamma=gamma, alpha=alpha,
        )
        out = pl.pallas_call(
            kern,
            out_shape=jax.ShapeDtypeStruct((padded_rows, LANES), pred.dtype),
            grid_spec=pltpu.PrefetchScalarGridSpec(
                num_scalar_prefetch=0,
                grid=(num_blocks,),
                in_specs=in_specs,
                out_specs=pl.BlockSpec((block_rows, LANES), lambda i: (i, 0)),
            ),
            compiler_params=cparams,
        )(pred2d, true2d)
        if padded_rows * LANES == total:
            return out.reshape(orig_shape)            # zero-copy
        return out.reshape(-1)[:total].reshape(orig_shape)


def _reference_focal_loss(pred, true, reduction="mean", gamma=GAMMA, alpha=ALPHA):
    """Pure-JAX reference mirroring the PyTorch module."""
    x = pred.astype(jnp.float32)
    y = true.astype(jnp.float32)
    bce = jnp.maximum(x, 0.0) - x * y + jnp.log1p(jnp.exp(-jnp.abs(x)))
    p = jax.nn.sigmoid(x)
    p_t = y * p + (1 - y) * (1 - p)
    af = y * alpha + (1 - y) * (1 - alpha)
    mf = (1.0 - p_t) ** gamma
    loss = bce * af * mf
    if reduction == "mean":
        return loss.mean()
    if reduction == "sum":
        return loss.sum()
    return loss


if __name__ == "__main__":
    key = jax.random.PRNGKey(0)
    k1, k2, k3, k4, k5, k6 = jax.random.split(key, 6)

    # 1) NCHW, typical yolo detection-head usage: B=2, C=4, H=W=16 (1024-aligned)
    pred = jax.random.normal(k1, (2, 4, 16, 16), dtype=jnp.float32)
    true = (jax.random.uniform(k2, (2, 4, 16, 16)) > 0.7).astype(jnp.float32)

    out_mean = jax.block_until_ready(focal_loss(pred, true, reduction="mean"))
    out_sum = jax.block_until_ready(focal_loss(pred, true, reduction="sum"))
    out_none = jax.block_until_ready(focal_loss(pred, true, reduction="none"))

    assert jnp.allclose(out_mean, _reference_focal_loss(pred, true, "mean"),
                        rtol=1e-4, atol=1e-6)
    assert jnp.allclose(out_sum, _reference_focal_loss(pred, true, "sum"),
                        rtol=1e-4, atol=1e-3)
    assert jnp.allclose(out_none, _reference_focal_loss(pred, true, "none"),
                        rtol=2e-4, atol=1e-5)

    # 2) Non-tile-aligned shape: exercises the masked-tail / padded path.
    pred2 = jax.random.normal(k3, (2, 3, 13, 7), dtype=jnp.float32)
    true2 = (jax.random.uniform(k4, (2, 3, 13, 7)) > 0.7).astype(jnp.float32)

    out_mean2 = jax.block_until_ready(focal_loss(pred2, true2, reduction="mean"))
    out_none2 = jax.block_until_ready(focal_loss(pred2, true2, reduction="none"))

    assert jnp.allclose(out_mean2, _reference_focal_loss(pred2, true2, "mean"),
                        rtol=1e-4, atol=1e-6)
    assert jnp.allclose(out_none2, _reference_focal_loss(pred2, true2, "none"),
                        rtol=2e-4, atol=1e-5)

    # 3) Larger aligned shape: exercises multi-block grid + in-kernel chunk loop.
    pred3 = jax.random.normal(k5, (2, 4, 128, 128), dtype=jnp.float32)
    true3 = (jax.random.uniform(k6, (2, 4, 128, 128)) > 0.7).astype(jnp.float32)

    out_mean3 = jax.block_until_ready(focal_loss(pred3, true3, reduction="mean"))
    out_none3 = jax.block_until_ready(focal_loss(pred3, true3, reduction="none"))

    assert jnp.allclose(out_mean3, _reference_focal_loss(pred3, true3, "mean"),
                        rtol=1e-4, atol=1e-6)
    assert jnp.allclose(out_none3, _reference_focal_loss(pred3, true3, "none"),
                        rtol=2e-4, atol=1e-5)

    print("KERNEL_OK")
</pallas_src>

<mosaic_0001>
module attributes {stable_mosaic.version = 11 : i64} {
  func.func @_focal_partial_sum_kernel(%arg0: i32, %arg1: memref<16x128xf32, #tpu.memory_space<vmem>>, %arg2: memref<16x128xf32, #tpu.memory_space<vmem>>, %arg3: memref<1x8x128xf32, #tpu.memory_space<vmem>>) attributes {dimension_semantics = [#tpu.dimension_semantics<parallel>], iteration_bounds = array<i64: 1>, scalar_prefetch = 0 : i64, scratch_operands = 0 : i64, tpu.core_type = #tpu.core_type<tc>, window_params = [{transform_indices = @transform_0, window_bounds = array<i64: 16, 128>}, {transform_indices = @transform_1, window_bounds = array<i64: 16, 128>}, {transform_indices = @transform_2, window_bounds = array<i64: 1, 8, 128>}]} {
    %cst = arith.constant 0.000000e+00 : f32
    %0 = vector.broadcast %cst : f32 to vector<8x128xf32>
    %c0 = arith.constant 0 : index
    %c0_0 = arith.constant 0 : index
    %1 = vector.load %arg1[%c0, %c0_0] : memref<16x128xf32, #tpu.memory_space<vmem>>, vector<16x128xf32>
    %c0_1 = arith.constant 0 : index
    %c0_2 = arith.constant 0 : index
    %2 = vector.load %arg2[%c0_1, %c0_2] : memref<16x128xf32, #tpu.memory_space<vmem>>, vector<16x128xf32>
    %3 = math.absf %1 : vector<16x128xf32>
    %cst_3 = arith.constant 0.000000e+00 : f32
    %4 = vector.broadcast %cst_3 : f32 to vector<16x128xf32>
    %5 = arith.subf %4, %3 : vector<16x128xf32>
    %6 = math.exp %5 : vector<16x128xf32>
    %cst_4 = arith.constant 0.000000e+00 : f32
    %7 = vector.broadcast %cst_4 : f32 to vector<16x128xf32>
    %8 = arith.maximumf %1, %7 : vector<16x128xf32>
    %9 = arith.mulf %1, %2 : vector<16x128xf32>
    %10 = arith.subf %8, %9 : vector<16x128xf32>
    %11 = math.log1p %6 : vector<16x128xf32>
    %12 = arith.addf %10, %11 : vector<16x128xf32>
    %cst_5 = arith.constant 1.000000e+00 : f32
    %13 = vector.broadcast %cst_5 : f32 to vector<16x128xf32>
    %14 = arith.addf %13, %6 : vector<16x128xf32>
    %15 = tpu.reciprocal %14 {approx = true} : vector<16x128xf32> -> vector<16x128xf32>
    %16 = arith.mulf %14, %15 : vector<16x128xf32>
    %cst_6 = arith.constant 2.000000e+00 : f32
    %17 = vector.broadcast %cst_6 : f32 to vector<16x128xf32>
    %18 = arith.subf %17, %16 : vector<16x128xf32>
    %19 = arith.mulf %15, %18 : vector<16x128xf32>
    %cst_7 = arith.constant 0.000000e+00 : f32
    %20 = vector.broadcast %cst_7 : f32 to vector<16x128xf32>
    %21 = arith.cmpf oge, %1, %20 : vector<16x128xf32>
    %22 = arith.mulf %6, %19 : vector<16x128xf32>
    %23 = arith.select %21, %19, %22 : vector<16x128xi1>, vector<16x128xf32>
    %cst_8 = arith.constant 2.000000e+00 : f32
    %24 = vector.broadcast %cst_8 : f32 to vector<16x128xf32>
    %25 = arith.mulf %24, %23 : vector<16x128xf32>
    %cst_9 = arith.constant 1.000000e+00 : f32
    %26 = vector.broadcast %cst_9 : f32 to vector<16x128xf32>
    %27 = arith.subf %26, %25 : vector<16x128xf32>
    %28 = arith.mulf %2, %27 : vector<16x128xf32>
    %29 = arith.addf %23, %28 : vector<16x128xf32>
    %cst_10 = arith.constant -5.000000e-01 : f32
    %30 = vector.broadcast %cst_10 : f32 to vector<16x128xf32>
    %31 = arith.mulf %2, %30 : vector<16x128xf32>
    %cst_11 = arith.constant 7.500000e-01 : f32
    %32 = vector.broadcast %cst_11 : f32 to vector<16x128xf32>
    %33 = arith.addf %32, %31 : vector<16x128xf32>
    %34 = math.sqrt %29 : vector<16x128xf32>
    %35 = arith.mulf %29, %34 : vector<16x128xf32>
    %36 = arith.mulf %12, %33 : vector<16x128xf32>
    %37 = arith.mulf %36, %35 : vector<16x128xf32>
    %38 = vector.shape_cast %37 : vector<16x128xf32> to vector<2x8x128xf32>
    %cst_12 = arith.constant dense<0.000000e+00> : vector<8x128xf32>
    %39 = vector.multi_reduction <add>, %38, %cst_12 [0] : vector<2x8x128xf32> to vector<8x128xf32>
    %40 = arith.addf %0, %39 : vector<8x128xf32>
    %c0_13 = arith.constant 0 : index
    %c0_14 = arith.constant 0 : index
    %c0_15 = arith.constant 0 : index
    %41 = vector.load %arg3[%c0_13, %c0_14, %c0_15] : memref<1x8x128xf32, #tpu.memory_space<vmem>>, vector<1x8x128xf32>
    %42 = vector.shape_cast %41 : vector<1x8x128xf32> to vector<8x128xf32>
    %43 = vector.shape_cast %40 : vector<8x128xf32> to vector<1x8x128xf32>
    tpu.vector_store %arg3[%c0_13, %c0_14, %c0_15], %43 {strides = array<i32>} : memref<1x8x128xf32, #tpu.memory_space<vmem>>, vector<1x8x128xf32>,
    return
  }
  func.func @transform_0(%arg0: i32) -> (i32, i32) {
    %c0_i32 = arith.constant 0 : i32
    %c0_i32_0 = arith.constant 0 : i32
    return %arg0, %c0_i32 : i32, i32
  }
  func.func @transform_1(%arg0: i32) -> (i32, i32) {
    %c0_i32 = arith.constant 0 : i32
    %c0_i32_0 = arith.constant 0 : i32
    return %arg0, %c0_i32 : i32, i32
  }
  func.func @transform_2(%arg0: i32) -> (i32, i32, i32) {
    %c0_i32 = arith.constant 0 : i32
    %c0_i32_0 = arith.constant 0 : i32
    %c0_i32_1 = arith.constant 0 : i32
    return %arg0, %c0_i32, %c0_i32_0 : i32, i32, i32
  }
}

</mosaic_0001>

<bundles_post_ra>
// kernel: tpu_custom_call.1
= control target key start
LH: loop header
LB: loop body
LE: loop exit
PB: predicated region body
PF: predicated region fallthrough
CT: control target
= control target key end

     0   :  { %7 = vsyncpa [#allocation3], 0  ;;  %s313_s0 = inlined_call_operand.hbm [shape: f32[16,128], index: 0, kind: input, shape index: {}]   ;;  %s314_s1 = inlined_call_operand.hbm [shape: f32[16,128], index: 1, kind: input, shape index: {}]   ;;  %s315_s2 = inlined_call_operand.hbm [shape: f32[1,8,128], index: 2, kind: output, shape index: {}]  }
   0x1   :  { %8 = vsyncpa [#allocation6], 0 }
   0x2   :  { %9 = vsyncpa [#allocation4], 0  ;;  %s14_s11 = sshll.u32 %s313_s0, 4  ;;  %s260_s12 = smov [#allocation2]   ;;  %s15_s11 = int_to_ptr.hbm [resolvable:$true] %s14_s11 }
   0x3   :  { %s16_s13 = sshll.u32 %s260_s12, 4  ;;  %s27_s16 = sshll.u32 %s314_s1, 4  ;;  %s17_s13 = int_to_ptr.vmem [resolvable:$true] %s16_s13  ;;  %s28_s16 = int_to_ptr.hbm [resolvable:$true] %s27_s16 }
   0x4   :  { %s261_s17 = smov 128   ;;  %s262_s18 = smov 8  }
   0x5   :  { %22 = dma.hbm_to_vmem [thread:$0]  %s15_s11, 256, %s17_s13, [#allocation3], %s261_s17, %s261_s17, %s262_s18  }
   0x6   :  { %s263_s19 = smov [#allocation5]  }
   0x7   :  { %s29_s20 = sshll.u32 %s263_s19, 4  ;;  %s30_s20 = int_to_ptr.vmem [resolvable:$true] %s29_s20 }
   0x8   :  { %35 = dma.hbm_to_vmem [thread:$0]  %s28_s16, 256, %s30_s20, [#allocation6], %s261_s17, %s261_s17, %s262_s18  }
   0x9   :  { %254 = dma.done.wait [#allocation3], 256  }
   0xa   :  { %255 = vsyncadd [#allocation3], 4294967040 }
   0xb   :  { %256 = dma.done.wait [#allocation6], 256  }
   0xc   :  { %257 = vsyncadd [#allocation6], 4294967040  ;;  %v286_v0 = vld [vmem:[#allocation2] sm:$0xff]  ;;  %v288_v1 = vld [vmem:[#allocation2 + $0x8] sm:$0xff]  ;;  %s264_s0 = smov [#allocation7]   ;;  %s150_s23 = sshll.u32 %s315_s2, 4  ;;  %s151_s23 = int_to_ptr.hbm [resolvable:$true] %s150_s23 }
   0xd   :  { %v48_v2 = vand.u32 2147483647, %v286_v0  ;;  %v49_v3 = vand.u32 2147483647, %v288_v1  ;;  %vm92_vm0 = vcmp.ge.f32.partialorder %v286_v0, 0.0  ;;  %vm93_vm1 = vcmp.ge.f32.partialorder %v288_v1, 0.0 }
   0xe   :  { %v46_v25 = vld [vmem:[#allocation5] sm:$0xff]  ;;  %v47_v27 = vld [vmem:[#allocation5 + $0x8] sm:$0xff]  ;;  %v56_v44 = vmax.f32 %v286_v0, 0.0  ;;  %v57_v45 = vmax.f32 %v288_v1, 0.0  ;;  %s148_s1 = sshll.u32 %s264_s0, 4  ;;  %s149_s1 = int_to_ptr.vmem [resolvable:$true] %s148_s1 }
   0xf   :  { %v50_v4 = vsub.f32 0.0, %v48_v2  ;;  %v51_v5 = vsub.f32 0.0, %v49_v3  ;;  %v58_v46 = vmul.f32 %v46_v25, %v286_v0  ;;  %v59_v48 = vmul.f32 %v47_v27, %v288_v1 }
  0x10   :  { %v106_v59 = vmul.f32 -0.5, %v46_v25  ;;  %v107_v60 = vmul.f32 -0.5, %v47_v27 }
  0x11   :  { %v52_v6 = vmul.f32 1.442695, %v50_v4  ;;  %v54_v7 = vmul.f32 1.442695, %v51_v5  ;;  %v60_v58 = vsub.f32 %v56_v44, %v58_v46  ;;  %v61_v62 = vsub.f32 %v57_v45, %v59_v48 }
  0x12   :  { %v108_v5 = vadd.f32 0.75, %v106_v59 }
  0x13   :  { %166 = vpow2.f32 %v52_v6  ;;  %v109_v6 = vadd.f32 0.75, %v107_v60 }
  0x14   :  { %168 = vpow2.f32 %v54_v7 }
  0x19   :  { %v167_v8 = vpop.eup %166 }
  0x1a   :  { %v169_v9 = vpop.eup %168  ;;  %v62_v10 = vadd.f32 1.0, %v167_v8  ;;  %v65_v34 = vmul.f32 -0.5, %v167_v8  ;;  %v68_v39 = vand.u32 2147483647, %v167_v8 }
  0x1b   :  { %v71_v11 = vadd.f32 1.0, %v169_v9  ;;  %v74_v35 = vmul.f32 -0.5, %v169_v9  ;;  %v77_v42 = vand.u32 2147483647, %v169_v9 }
  0x1c   :  { %170 = vrcp.f32 %v62_v10  ;;  %v66_v37 = vadd.f32 1.0, %v65_v34  ;;  %vm298_vm2 = vcmp.lt.f32.partialorder %v68_v39, 0.0004427343 }
  0x1d   :  { %172 = vrcp.f32 %v71_v11  ;;  %v75_v40 = vadd.f32 1.0, %v74_v35  ;;  %vm302_vm3 = vcmp.lt.f32.partialorder %v77_v42, 0.0004427343 }
  0x1e   :  { %174 = vlog2.f32 %v62_v10  ;;  %v67_v50 = vmul.f32 %v167_v8, %v66_v37 }
  0x1f   :  { %176 = vlog2.f32 %v71_v11  ;;  %v76_v54 = vmul.f32 %v169_v9, %v75_v40 }
  0x22   :  { %v171_v12 = vpop.eup %170 }
  0x23   :  { %v173_v13 = vpop.eup %172  ;;  %v86_v14 = vmul.f32 %v171_v12, %v62_v10 }
  0x24   :  { %v87_v15 = vmul.f32 %v173_v13, %v71_v11  ;;  %v175_v36 = vpop.eup %174 }
  0x25   :  { %v88_v16 = vsub.f32 2.0, %v86_v14  ;;  %v177_v38 = vpop.eup %176  ;;  %v64_v49 = vmul.f32 0.6931472, %v175_v36 }
  0x26   :  { %v89_v17 = vsub.f32 2.0, %v87_v15  ;;  %v73_v53 = vmul.f32 0.6931472, %v177_v38 }
  0x27   :  { %v90_v18 = vmul.f32 %v171_v12, %v88_v16  ;;  %v70_v63 = vsel %vm298_vm2, %v67_v50, %v64_v49 }
  0x28   :  { %v91_v19 = vmul.f32 %v173_v13, %v89_v17  ;;  %v79_v1 = vsel %vm302_vm3, %v76_v54, %v73_v53  ;;  %v80_v4 = vadd.f32 %v70_v63, %v60_v58 }
  0x29   :  { %v94_v20 = vmul.f32 %v167_v8, %v90_v18  ;;  %v81_v8 = vadd.f32 %v79_v1, %v61_v62 }
  0x2a   :  { %v95_v21 = vmul.f32 %v169_v9, %v91_v19  ;;  %v136_v15 = vmul.f32 %v108_v5, %v80_v4 }
  0x2b   :  { %v96_v22 = vsel %vm92_vm0, %v90_v18, %v94_v20  ;;  %v137_v18 = vmul.f32 %v109_v6, %v81_v8 }
  0x2c   :  { %v97_v23 = vsel %vm93_vm1, %v91_v19, %v95_v21  ;;  %v98_v24 = vmul.f32 2.0, %v96_v22 }
  0x2d   :  { %v99_v26 = vmul.f32 2.0, %v97_v23 }
  0x2e   :  { %v100_v28 = vsub.f32 1.0, %v98_v24 }
  0x2f   :  { %v101_v29 = vsub.f32 1.0, %v99_v26 }
  0x30   :  { %v102_v30 = vmul.f32 %v100_v28, %v46_v25 }
  0x31   :  { %v103_v31 = vmul.f32 %v101_v29, %v47_v27 }
  0x32   :  { %v104_v32 = vadd.f32 %v102_v30, %v96_v22 }
  0x33   :  { %v105_v33 = vadd.f32 %v103_v31, %v97_v23 }
  0x34   :  { %178 = vrsqrt.f32 %v104_v32  ;;  %vm117_vm4 = vcmp.eq.f32.partialorder %v104_v32, inf  ;;  %v120_v9 = vand.u32 2147483648, %v104_v32  ;;  %vm119_vm5 = vcmp.eq.f32.partialorder %v104_v32, 0.0 }
  0x35   :  { %180 = vrsqrt.f32 %v105_v33  ;;  %vm129_vm6 = vcmp.eq.f32.partialorder %v105_v33, inf  ;;  %v132_v12 = vand.u32 2147483648, %v105_v33  ;;  %vm131_vm7 = vcmp.eq.f32.partialorder %v105_v33, 0.0 }
  0x3a   :  { %v179_v41 = vpop.eup %178 }
  0x3b   :  { %v181_v43 = vpop.eup %180  ;;  %v111_v47 = vmul.f32 %v179_v41, %v104_v32 }
  0x3c   :  { %v123_v51 = vmul.f32 %v181_v43, %v105_v33 }
  0x3d   :  { %v112_v55 = vmul.f32 %v179_v41, %v111_v47 }
  0x3e   :  { %v124_v57 = vmul.f32 %v181_v43, %v123_v51 }
  0x3f   :  { %v113_v61 = vmul.f32 0.5, %v112_v55 }
  0x40   :  { %v125_v0 = vmul.f32 0.5, %v124_v57 }
  0x41   :  { %v114_v2 = vsub.f32 1.5, %v113_v61 }
  0x42   :  { %v126_v3 = vsub.f32 1.5, %v125_v0 }
  0x43   :  { %v115_v7 = vmul.f32 %v179_v41, %v114_v2 }
  0x44   :  { %v127_v10 = vmul.f32 %v181_v43, %v126_v3 }
  0x45   :  { %v116_v11 = vmul.f32 %v115_v7, %v104_v32 }
  0x46   :  { %v128_v13 = vmul.f32 %v127_v10, %v105_v33 }
  0x47   :  { %v118_v14 = vsel %vm117_vm4, %v104_v32, %v116_v11 }
  0x48   :  { %v121_v16 = vsel %vm119_vm5, %v120_v9, %v118_v14  ;;  %v130_v17 = vsel %vm129_vm6, %v105_v33, %v128_v13 }
  0x49   :  { %v133_v19 = vsel %vm131_vm7, %v132_v12, %v130_v17  ;;  %v134_v20 = vmul.f32 %v121_v16, %v104_v32 }
  0x4a   :  { %v135_v21 = vmul.f32 %v133_v19, %v105_v33 }
  0x4b   :  { %v138_v22 = vmul.f32 %v136_v15, %v134_v20 }
  0x4c   :  { %v139_v23 = vmul.f32 %v137_v18, %v135_v21 }
  0x4e   :  { %v140_v24 = vadd.f32 %v139_v23, %v138_v22 }
  0x50   :  { %142 = vst [vmem:[#allocation7] sm:$0xff] %v140_v24 }
  0x51   :  { %153 = dma.vmem_to_hbm [thread:$0]  %s149_s1, 128, %s151_s23, [#allocation4]  }
  0x52   :  { %258 = dma.done.wait [#allocation4], 128  }
  0x53   :  { %259 = vsyncadd [#allocation4], 4294967168 }
  0x54   :  { %158 = vsyncpa [#allocation3], 1 }
  0x55   :  { %159 = vsyncpa [#allocation6], 1 }
  0x56   :  { %160 = vsyncpa [#allocation4], 1 }

</bundles_post_ra>
